<compile_context>
chip_gen: v5e
topology: v5e:2x2
jax: 0.10.0
libtpu: 0.0.40
codegen_flags: <defaults>
</compile_context>

<pallas_src>
import math
import numpy as np
import jax
import jax.numpy as jnp
from jax.experimental import pallas as pl
from jax.experimental.pallas import tpu as pltpu

# ---- small config consistent with the module ----
BS, SEQ, HIDDEN, HEADS = 2, 8, 32, 4
HEAD_DIM = HIDDEN // HEADS
MAX_POS = 512                 # max_position_embeddings / max_relative_position
ATT_SPAN = MAX_POS
POS_LEN = 2 * MAX_POS         # 1024 relative-position embeddings
BUCKET_SIZE = 256

SCALE_C = 1.0 / math.sqrt(3.0 * HEADS)    # content and p2c scaling
SCALE_P = 1.0 / math.sqrt(3.0 * HIDDEN)   # c2p scaling (all_head_size * 3)


# ---------------- relative-position table (DeBERTa log buckets) ----------------
def make_log_bucket_position(relative_pos, bucket_size, max_position):
    sign = np.sign(relative_pos).astype(np.float64)
    mid = bucket_size // 2
    abs_pos = np.where((relative_pos < mid) & (relative_pos > -mid),
                       mid - 1, np.abs(relative_pos)).astype(np.float64)
    log_pos = np.ceil(np.log(abs_pos / mid) /
                      np.log((max_position - 1) / mid) * (mid - 1)) + mid
    bucket_pos = np.where(abs_pos <= mid,
                          relative_pos.astype(np.float64),
                          log_pos * sign)
    return bucket_pos.astype(np.int64)


def build_relative_position(q_size, k_size, bucket_size, max_position):
    q_ids = np.arange(q_size)
    k_ids = np.arange(k_size)
    rel = q_ids[:, None] - k_ids[None, :]
    if bucket_size > 0 and max_position > 0:
        rel = make_log_bucket_position(rel, bucket_size, max_position)
    return rel.astype(np.int32)


# ---------------- Pallas kernels ----------------
def _linear_kernel(x_ref, w_ref, b_ref, o_ref):
    # y = x @ W + b  (W stored [in, out])
    o_ref[...] = (jnp.dot(x_ref[...], w_ref[...],
                          preferred_element_type=jnp.float32) + b_ref[...])


def linear(x2d, w, b):
    # Used only for the (cacheable) positional-key precompute at toy sizes.
    # TODO(synk): tile over M/N with a K-reduction grid axis at production shapes.
    M, K = x2d.shape
    N = w.shape[1]
    return pl.pallas_call(
        _linear_kernel,
        out_shape=jax.ShapeDtypeStruct((M, N), jnp.float32),
        grid=(1,),
        in_specs=[pl.BlockSpec((M, K), lambda i: (0, 0)),
                  pl.BlockSpec((K, N), lambda i: (0, 0)),
                  pl.BlockSpec((1, N), lambda i: (0, 0))],
        out_specs=pl.BlockSpec((M, N), lambda i: (0, 0)),
    )(x2d, w, b.reshape(1, N))


def _fused_attention_kernel(x_ref, wqkv_ref, bqkv_ref, pkt_ref, onehot_ref,
                            mask_ref, o_ref):
    # Per grid point b:
    #   x:     [1, S, hidden]        wqkv: [hidden, 3*hidden]   bqkv: [1, 3*hidden]
    #   pkt:   [H, dh, W]  (windowed, pre-transposed positional key)
    #   onehot:[S, S, W]   (trace-time-constant gather pattern)
    #   mask:  [1, 1, S]   (additive)
    #   out:   [1, S, hidden]
    x = x_ref[0]                                                       # [S, hidden]
    qkv = jnp.dot(x, wqkv_ref[...],
                  preferred_element_type=jnp.float32) + bqkv_ref[...]  # [S, 3*hidden]
    mask = mask_ref[0]                                                 # [1, S]
    onehot = onehot_ref[...]                                           # [S, S, W]

    outs = []
    for h in range(HEADS):                                             # static unroll
        q = qkv[:, h * HEAD_DIM:(h + 1) * HEAD_DIM]                    # [S, dh]
        k = qkv[:, HIDDEN + h * HEAD_DIM:HIDDEN + (h + 1) * HEAD_DIM]  # [S, dh]
        v = qkv[:, 2 * HIDDEN + h * HEAD_DIM:2 * HIDDEN + (h + 1) * HEAD_DIM]
        pkt = pkt_ref[h]                                               # [dh, W]

        # content -> content
        s = jnp.dot(q, k.T, preferred_element_type=jnp.float32) * SCALE_C        # [S, S]
        # content -> position / position -> content, against the W-wide window only
        # (scales folded onto q/k: far fewer VPU ops than scaling the table)
        c2p_full = jnp.dot(q * SCALE_P, pkt, preferred_element_type=jnp.float32)  # [S, W]
        p2c_full = jnp.dot(k * SCALE_C, pkt, preferred_element_type=jnp.float32)  # [S, W]
        # torch.gather (index depends only on (i, j)) via a tiny one-hot reduction
        c2p = jnp.sum(onehot * c2p_full[:, None, :], axis=-1)                     # [S, S]
        p2c = jnp.sum(onehot * p2c_full[None, :, :], axis=-1)                     # [S, S]

        score = s + c2p + p2c + mask                                               # [S, S]

        # softmax over keys (dim=3 in the reference)
        m = jnp.max(score, axis=-1, keepdims=True)
        e = jnp.exp(score - m)
        denom = jnp.sum(e, axis=-1, keepdims=True)
        r = pl.reciprocal(denom, approx=True)
        r = r * (2.0 - denom * r)        # one Newton step -> full f32 accuracy
        probs = e * r

        outs.append(jnp.dot(probs, v, preferred_element_type=jnp.float32))         # [S, dh]

    # head-concatenated, lane-dense store of the whole [S, hidden] block
    o_ref[0] = jnp.concatenate(outs, axis=-1)


# ---------------- cacheable positional precompute (input-independent) ----------------
def build_pos_cache(params, seq):
    """Everything that depends only on parameters / seq_len (cache across forwards).

    Returns:
      pk_t:   [HEADS, HEAD_DIM, W] f32 -- pos_key(rel_emb) restricted to the window
              of relative-position buckets used at this seq_len, pre-transposed.
      onehot: [seq, seq, W] f32        -- gather pattern: onehot[i,j,w] == 1 iff
              clamp(rel_pos[i,j] + att_span, 0, 2*att_span-1) == window_lo + w.
    """
    rel_pos = build_relative_position(seq, seq, BUCKET_SIZE, MAX_POS)           # [S, S]
    c2p_pos = np.clip(rel_pos + ATT_SPAN, 0, 2 * ATT_SPAN - 1).astype(np.int64)
    lo, hi = int(c2p_pos.min()), int(c2p_pos.max())
    w = hi - lo + 1                                                             # 2*S-1 here
    onehot = (c2p_pos[:, :, None] - lo == np.arange(w)[None, None, :])
    onehot = jnp.asarray(onehot.astype(np.float32))                             # [S, S, W]

    # pos_key projection on the window only (pos_dropout = identity).
    rel_win = params['rel_emb'][lo:hi + 1]                                      # [W, hidden]
    pk2d = linear(rel_win, params['wpk'], params['bpk'])                        # [W, hidden]
    pk_t = pk2d.reshape(w, HEADS, HEAD_DIM).transpose(1, 2, 0)                  # [H, dh, W]
    return pk_t, onehot


# ---------------- wrapper (glue: parameter plumbing only) ----------------
def bert_self_attention(hidden_states, attention_mask, params, pos_cache=None):
    bs, seq, hidden = hidden_states.shape
    if pos_cache is None:
        pos_cache = build_pos_cache(params, seq)
    pk_t, onehot = pos_cache
    w = pk_t.shape[-1]

    # fused QKV weights (parameter plumbing; store fused / cache in a real deployment)
    wqkv = jnp.concatenate([params['wq'], params['wk'], params['wv']], axis=1)   # [hid, 3*hid]
    bqkv = jnp.concatenate([params['bq'], params['bk'], params['bv']]).reshape(1, 3 * hidden)

    x = hidden_states.astype(jnp.float32)
    mask3 = attention_mask.reshape(bs, 1, seq).astype(jnp.float32)

    return pl.pallas_call(
        _fused_attention_kernel,
        out_shape=jax.ShapeDtypeStruct((bs, seq, hidden), jnp.float32),
        grid=(bs,),
        in_specs=[
            pl.BlockSpec((1, seq, hidden), lambda b: (b, 0, 0)),        # x
            pl.BlockSpec((hidden, 3 * hidden), lambda b: (0, 0)),       # fused QKV weight
            pl.BlockSpec((1, 3 * hidden), lambda b: (0, 0)),            # fused QKV bias
            pl.BlockSpec((HEADS, HEAD_DIM, w), lambda b: (0, 0, 0)),    # windowed pos key (resident)
            pl.BlockSpec((seq, seq, w), lambda b: (0, 0, 0)),           # gather one-hot (resident)
            pl.BlockSpec((1, 1, seq), lambda b: (b, 0, 0)),             # additive mask
        ],
        out_specs=pl.BlockSpec((1, seq, hidden), lambda b: (b, 0, 0)),  # lane-dense output
        compiler_params=pltpu.CompilerParams(
            dimension_semantics=("parallel",)),     # bs=2 blocks -> both v7x TensorCores
    )(x, wqkv, bqkv, pk_t, onehot, mask3)


# ---------------- pure-JAX reference (original full-table semantics) ----------------
def reference(hidden_states, attention_mask, params):
    bs, seq, hidden = hidden_states.shape

    def transform(x, w, b):
        p = (x @ w + b).reshape(x.shape[0], x.shape[1], HEADS, HEAD_DIM)
        return p.transpose(0, 2, 1, 3)

    q = transform(hidden_states, params['wq'], params['bq'])
    k = transform(hidden_states, params['wk'], params['bk'])
    v = transform(hidden_states, params['wv'], params['bv'])

    s_content = (q @ jnp.swapaxes(k, -1, -2)) / math.sqrt(3 * HEADS)

    pk = transform(params['rel_emb'][None], params['wpk'], params['bpk'])[0]  # [H, P, dh]

    rel_pos = jnp.asarray(build_relative_position(seq, seq, BUCKET_SIZE, MAX_POS))
    c2p_pos = jnp.clip(rel_pos + ATT_SPAN, 0, 2 * ATT_SPAN - 1)
    c2p_idx = jnp.broadcast_to(c2p_pos, (bs, HEADS, seq, seq))

    c2p_att = q @ (jnp.swapaxes(pk, -1, -2)[None] / math.sqrt(HIDDEN * 3))    # [bs,H,S,P]
    c2p_att = jnp.take_along_axis(c2p_att, c2p_idx, axis=-1)
    p2c_att = (pk[None] / math.sqrt(3 * HEADS)) @ jnp.swapaxes(k, -1, -2)     # [bs,H,P,S]
    p2c_att = jnp.take_along_axis(p2c_att, c2p_idx, axis=-2)

    score = s_content + c2p_att + p2c_att + attention_mask
    probs = jax.nn.softmax(score, axis=-1)
    out = probs @ v
    return out.transpose(0, 2, 1, 3).reshape(bs, seq, hidden)


# ---------------- main ----------------
if __name__ == "__main__":
    key = jax.random.PRNGKey(0)
    ks = jax.random.split(key, 16)

    def w_init(k):
        return (jax.random.normal(k, (HIDDEN, HIDDEN), jnp.float32) * 0.02)

    def b_init(k):
        return (jax.random.normal(k, (HIDDEN,), jnp.float32) * 0.02)

    params = {
        'wq': w_init(ks[0]), 'bq': b_init(ks[1]),
        'wk': w_init(ks[2]), 'bk': b_init(ks[3]),
        'wv': w_init(ks[4]), 'bv': b_init(ks[5]),
        'wpk': w_init(ks[6]), 'bpk': b_init(ks[7]),
        # relative_position_embeddings.weight : [2*max_relative_position, hidden]
        'rel_emb': jax.random.normal(ks[8], (POS_LEN, HIDDEN), jnp.float32) * 0.02,
    }

    hidden_states = jax.random.normal(ks[9], (BS, SEQ, HIDDEN), jnp.float32)
    # additive attention mask [bs, 1, 1, seq]: 0 for keep, -10000 for masked
    mask_bits = jax.random.uniform(ks[10], (BS, 1, 1, SEQ)) < 0.2
    attention_mask = jnp.where(mask_bits, -10000.0, 0.0).astype(jnp.float32)

    # input-independent precompute (cache across forward calls)
    pos_cache = build_pos_cache(params, SEQ)

    out = bert_self_attention(hidden_states, attention_mask, params, pos_cache)
    out = jax.block_until_ready(out)

    ref = jax.block_until_ready(reference(hidden_states, attention_mask, params))
    assert out.shape == (BS, SEQ, HIDDEN)
    np.testing.assert_allclose(np.asarray(out), np.asarray(ref), rtol=2e-4, atol=2e-4)

    print("KERNEL_OK")
</pallas_src>

<mosaic_0001>
module attributes {stable_mosaic.version = 11 : i64} {
  func.func @_linear_kernel(%arg0: i32, %arg1: memref<15x32xf32, #tpu.memory_space<vmem>>, %arg2: memref<32x32xf32, #tpu.memory_space<vmem>>, %arg3: memref<1x32xf32, #tpu.memory_space<vmem>>, %arg4: memref<15x32xf32, #tpu.memory_space<vmem>>) attributes {dimension_semantics = [#tpu.dimension_semantics<arbitrary>], iteration_bounds = array<i64: 1>, scalar_prefetch = 0 : i64, scratch_operands = 0 : i64, tpu.core_type = #tpu.core_type<tc>, window_params = [{pipeline_mode = #tpu.pipeline_mode<synchronous>, transform_indices = @transform_0, window_bounds = array<i64: 15, 32>}, {pipeline_mode = #tpu.pipeline_mode<synchronous>, transform_indices = @transform_1, window_bounds = array<i64: 32, 32>}, {pipeline_mode = #tpu.pipeline_mode<synchronous>, transform_indices = @transform_2, window_bounds = array<i64: 1, 32>}, {pipeline_mode = #tpu.pipeline_mode<synchronous>, transform_indices = @transform_3, window_bounds = array<i64: 15, 32>}]} {
    %c0 = arith.constant 0 : index
    %c0_0 = arith.constant 0 : index
    %0 = vector.load %arg1[%c0, %c0_0] : memref<15x32xf32, #tpu.memory_space<vmem>>, vector<15x32xf32>
    %c0_1 = arith.constant 0 : index
    %c0_2 = arith.constant 0 : index
    %1 = vector.load %arg2[%c0_1, %c0_2] : memref<32x32xf32, #tpu.memory_space<vmem>>, vector<32x32xf32>
    %cst = arith.constant dense<0.000000e+00> : vector<15x32xf32>
    %2 = tpu.matmul %0, %1, %cst {dimension_numbers = #tpu.dot_dimension_numbers<[1], [0], [0], [1], [0, 0, 1, 1], [], []>} : vector<15x32xf32>, vector<32x32xf32>, vector<15x32xf32> -> vector<15x32xf32>
    %c0_3 = arith.constant 0 : index
    %c0_4 = arith.constant 0 : index
    %3 = vector.load %arg3[%c0_3, %c0_4] : memref<1x32xf32, #tpu.memory_space<vmem>>, vector<1x32xf32>
    %4 = vector.broadcast %3 : vector<1x32xf32> to vector<15x32xf32>
    %5 = arith.addf %2, %4 : vector<15x32xf32>
    %c0_5 = arith.constant 0 : index
    %c0_6 = arith.constant 0 : index
    %6 = vector.load %arg4[%c0_5, %c0_6] : memref<15x32xf32, #tpu.memory_space<vmem>>, vector<15x32xf32>
    tpu.vector_store %arg4[%c0_5, %c0_6], %5 {strides = array<i32>} : memref<15x32xf32, #tpu.memory_space<vmem>>, vector<15x32xf32>,
    return
  }
  func.func @transform_0(%arg0: i32) -> (i32, i32) {
    %c0_i32 = arith.constant 0 : i32
    %c0_i32_0 = arith.constant 0 : i32
    %c0_i32_1 = arith.constant 0 : i32
    return %c0_i32, %c0_i32_0 : i32, i32
  }
  func.func @transform_1(%arg0: i32) -> (i32, i32) {
    %c0_i32 = arith.constant 0 : i32
    %c0_i32_0 = arith.constant 0 : i32
    %c0_i32_1 = arith.constant 0 : i32
    return %c0_i32, %c0_i32_0 : i32, i32
  }
  func.func @transform_2(%arg0: i32) -> (i32, i32) {
    %c0_i32 = arith.constant 0 : i32
    %c0_i32_0 = arith.constant 0 : i32
    %c0_i32_1 = arith.constant 0 : i32
    return %c0_i32, %c0_i32_0 : i32, i32
  }
  func.func @transform_3(%arg0: i32) -> (i32, i32) {
    %c0_i32 = arith.constant 0 : i32
    %c0_i32_0 = arith.constant 0 : i32
    %c0_i32_1 = arith.constant 0 : i32
    return %c0_i32, %c0_i32_0 : i32, i32
  }
}

</mosaic_0001>

<bundles_post_ra>
// kernel: tpu_custom_call.1
= control target key start
LH: loop header
LB: loop body
LE: loop exit
PB: predicated region body
PF: predicated region fallthrough
CT: control target
= control target key end

     0   :  { %8 = vsyncpa [#allocation3], 0  ;;  %s249_s0 = inlined_call_operand.hbm [shape: f32[15,32], index: 0, kind: input, shape index: {}]   ;;  %s250_s1 = inlined_call_operand.hbm [shape: f32[32,32], index: 1, kind: input, shape index: {}]   ;;  %s251_s2 = inlined_call_operand.vmem [shape: f32[1,32], index: 2, kind: input, shape index: {}]   ;;  %s252_s3 = inlined_call_operand.hbm [shape: f32[15,32], index: 3, kind: output, shape index: {}]  }
   0x1   :  { %9 = vsyncpa [#allocation6], 0 }
   0x2   :  { %10 = vsyncpa [#allocation4], 0  ;;  %s15_s14 = sshll.u32 %s249_s0, 4  ;;  %s200_s15 = smov [#allocation2]   ;;  %s16_s14 = int_to_ptr.hbm [resolvable:$true] %s15_s14 }
   0x3   :  { %s17_s16 = sshll.u32 %s200_s15, 4  ;;  %s28_s19 = sshll.u32 %s250_s1, 4  ;;  %s18_s16 = int_to_ptr.vmem [resolvable:$true] %s17_s16  ;;  %s29_s19 = int_to_ptr.hbm [resolvable:$true] %s28_s19 }
   0x4   :  { %s201_s20 = smov 128   ;;  %s202_s21 = smov 8  }
   0x5   :  { %23 = dma.hbm_to_vmem [thread:$0]  %s16_s14, 256, %s18_s16, [#allocation3], %s201_s20, %s201_s20, %s202_s21  }
   0x6   :  { %s203_s22 = smov [#allocation5]  }
   0x7   :  { %s30_s23 = sshll.u32 %s203_s22, 4  ;;  %s31_s23 = int_to_ptr.vmem [resolvable:$true] %s30_s23 }
   0x8   :  { %36 = dma.hbm_to_vmem [thread:$0]  %s29_s19, 512, %s31_s23, [#allocation6], %s201_s20, %s201_s20, %s202_s21  }
   0x9   :  { %194 = dma.done.wait [#allocation3], 256  }
   0xa   :  { %195 = vsyncadd [#allocation3], 4294967040 }
   0xb   :  { %196 = dma.done.wait [#allocation6], 512  }
   0xc   :  { %197 = vsyncadd [#allocation6], 4294966784  ;;  %v52_v0 = vld [vmem:[#allocation5 + $0x18] sm:$0xff]  ;;  %v51_v1 = vld [vmem:[#allocation5 + $0x10] sm:$0xff]  ;;  %vm57_vm0 = vcmask 261120   ;;  %s204_s24 = smov [#allocation7]  }
   0xd   :  { %76 = vmatpush.msra.mxu0 %v52_v0  ;;  %112 = vmatpush.msra.mxu1 %v52_v0  ;;  %v50_v2 = vld [vmem:[#allocation5 + $0x8] sm:$0xff]  ;;  %v49_v3 = vld [vmem:[#allocation5] sm:$0xff]  ;;  %v47_v4 = vld [vmem:[#allocation2] sm:$0xff]  ;;  %s94_s25 = sshll.u32 %s204_s24, 4  ;;  %s96_s28 = sshll.u32 %s252_s3, 4  ;;  %vm88_vm1 = vcmask 260096   ;;  %s95_s25 = int_to_ptr.vmem [resolvable:$true] %s94_s25  ;;  %s97_s28 = int_to_ptr.hbm [resolvable:$true] %s96_s28 }
   0xe   :  { %v48_v5 = vld [vmem:[#allocation2 + $0x8] sm:$0x7f]  ;;  %v121_v6 = vld [vmem:[%s251_s2] ss:$0 sm:$0xff] }
   0xf   :  { %77 = vmatpush.msra.mxu0 %v51_v1  ;;  %113 = vmatpush.msra.mxu1 %v51_v1 }
  0x11   :  { %78 = vmatpush.msra.mxu0 %v50_v2  ;;  %114 = vmatpush.msra.mxu1 %v50_v2 }
  0x13   :  { %79 = vmatpush.msra.mxu0 %v49_v3  ;;  %115 = vmatpush.msra.mxu1 %v49_v3 }
  0x14   :  { %110 = vmatmul.msk.f32.vlgmr.msra.gmra.mxu0 %vm57_vm0, %v47_v4  ;;  %111 = vmatmul.msk.f32.vlgmr.msra.gmra.mxu1 %vm57_vm0, %v48_v5 }
  0x91   :  { %v81_v7 = vpop.f32.mrf.mxu0  ;;  %v84_v8 = vpop.f32.mrf.mxu1 }
  0x92   :  { %v82_v9 = vadd.f32 %v121_v6, %v81_v7  ;;  %v85_v10 = vadd.f32 %v121_v6, %v84_v8 }
  0x94   :  { %87 = vst.msk [vmem:[#allocation7] sm:$0xff] %vm57_vm0, %v82_v9 }
  0x95   :  { %89 = vst.msk [vmem:[#allocation7 + $0x8] sm:$0x7f] %vm88_vm1, %v85_v10 }
  0x96   :  { %102 = dma.vmem_to_hbm [thread:$0]  %s95_s25, 256, %s97_s28, [#allocation4], %s201_s20, %s201_s20, %s202_s21  }
  0x97   :  { %198 = dma.done.wait [#allocation4], 256  }
  0x98   :  { %199 = vsyncadd [#allocation4], 4294967040 }
  0x99   :  { %107 = vsyncpa [#allocation3], 1 }
  0x9a   :  { %108 = vsyncpa [#allocation6], 1 }
  0x9b   :  { %109 = vsyncpa [#allocation4], 1 }

</bundles_post_ra>
